<compile_context>
chip_gen: v6e
topology: v6e:2x2x1
jax: 0.10.0
libtpu: 0.0.40
codegen_flags: <defaults>
</compile_context>

<pallas_src>
import functools
import math

import jax
import jax.numpy as jnp
from jax.experimental import pallas as pl
from jax.experimental.pallas import tpu as pltpu


def _round_up(x, m):
    return (x + m - 1) // m * m


def _pick_tile(total, candidates):
    for c in candidates:
        if total % c == 0:
            return c
    return total


# ----------------------------------------------------------------------------
# Tiled matmul + bias + ReLU kernel (the Conv2d hot path on the MXU)
# ----------------------------------------------------------------------------
def _mm_bias_relu_kernel(x_ref, w_ref, b_ref, o_ref, acc_ref):
    k = pl.program_id(2)

    @pl.when(k == 0)
    def _init():
        acc_ref[...] = jnp.zeros_like(acc_ref)

    # bf16 x bf16 -> f32 accumulation on the MXU.
    acc_ref[...] += jnp.dot(x_ref[...], w_ref[...],
                            preferred_element_type=jnp.float32)

    @pl.when(k == pl.num_programs(2) - 1)
    def _finalize():
        out = acc_ref[...] + b_ref[...]          # (1, tn) broadcast over (tm, tn)
        o_ref[...] = jnp.maximum(out, 0.0).astype(o_ref.dtype)


def matmul_bias_relu(x, w, b):
    """relu(x @ w + b).

    x: (M, K)  bf16   (im2col patches; K already padded to a multiple of 128)
    w: (K, N)  bf16   (pre-packed weights; K, N multiples of 128)
    b: (1, N)  f32
    returns (M, N) f32
    """
    M, K = x.shape
    Kw, N = w.shape
    assert K == Kw and b.shape == (1, N)
    assert K % 128 == 0 and N % 128 == 0

    tm = 256                                   # M tile
    tn = 128                                   # N tile: 128 for v5e MXU / 1 vst slot
    tk = _pick_tile(K, (512, 256, 128))        # K tile

    Mp = _round_up(M, tm)
    if Mp != M:
        x = jnp.pad(x, ((0, Mp - M), (0, 0)))

    grid = (Mp // tm, N // tn, K // tk)

    flops = 2 * Mp * N * K
    bytes_accessed = (Mp * K + K * N) * 2 + Mp * N * 4 + N * 4

    out = pl.pallas_call(
        _mm_bias_relu_kernel,
        out_shape=jax.ShapeDtypeStruct((Mp, N), jnp.float32),
        grid_spec=pltpu.PrefetchScalarGridSpec(
            num_scalar_prefetch=0,
            grid=grid,
            in_specs=[
                pl.BlockSpec((tm, tk), lambda i, j, k: (i, k)),   # patches
                pl.BlockSpec((tk, tn), lambda i, j, k: (k, j)),   # weights
                pl.BlockSpec((1, tn), lambda i, j, k: (0, j)),    # bias
            ],
            out_specs=pl.BlockSpec((tm, tn), lambda i, j, k: (i, j)),
            scratch_shapes=[pltpu.VMEM((tm, tn), jnp.float32)],
        ),
        compiler_params=pltpu.CompilerParams(
            dimension_semantics=("parallel", "parallel", "arbitrary"),
            vmem_limit_bytes=32 * 1024 * 1024,
        ),
        cost_estimate=pl.CostEstimate(
            flops=flops, transcendentals=0, bytes_accessed=bytes_accessed),
    )(x, w, b)
    return out[:M]


# ----------------------------------------------------------------------------
# Conv2d = im2col (XLA data-movement glue) + tiled Pallas matmul
# ----------------------------------------------------------------------------
def pack_conv2d_params(w_oihw, b, *, lane=128):
    """One-time (hoisted) weight packing: OIHW -> lane-dense bf16 matmul layout."""
    Cout, Cin, KH, KW = w_oihw.shape
    K = KH * KW * Cin
    Kp = _round_up(K, lane)
    Np = _round_up(Cout, lane)
    # (Cout, Cin, KH, KW) -> (KH, KW, Cin, Cout) -> (K, Cout): matches im2col order.
    wm = jnp.transpose(w_oihw, (2, 3, 1, 0)).reshape(K, Cout)
    wm = jnp.pad(wm, ((0, Kp - K), (0, Np - Cout))).astype(jnp.bfloat16)
    bp = jnp.pad(b, (0, Np - Cout)).reshape(1, Np).astype(jnp.float32)
    meta = dict(Cout=Cout, Cin=Cin, KH=KH, KW=KW, Kp=Kp, Np=Np)
    return wm, bp, meta


def _im2col(x_nhwc, kh, kw, stride, padding, k_pad):
    B, H, W, C = x_nhwc.shape
    xp = jnp.pad(x_nhwc, ((0, 0), (padding, padding), (padding, padding), (0, 0)))
    Ho = (H + 2 * padding - kh) // stride + 1
    Wo = (W + 2 * padding - kw) // stride + 1
    # TODO(synk): fold the patch extraction into the kernel itself (manual halo
    # DMA with memory_space=pl.ANY + make_async_copy) so the kh*kw-expanded
    # matrix never round-trips through HBM for large images.
    patches = []
    for i in range(kh):
        for j in range(kw):
            patches.append(xp[:, i:i + stride * Ho:stride,
                               j:j + stride * Wo:stride, :])
    cols = jnp.concatenate(patches, axis=-1).astype(jnp.bfloat16)
    cols = cols.reshape(B * Ho * Wo, kh * kw * C)
    K = kh * kw * C
    if k_pad != K:
        cols = jnp.pad(cols, ((0, 0), (0, k_pad - K)))
    return cols, (B, Ho, Wo)


def conv2d_relu_forward(x_nchw, wm, bp, *, meta, stride, padding):
    """PyTorch-semantics Conv2d(stride, padding) followed by ReLU (fused)."""
    x = jnp.transpose(x_nchw, (0, 2, 3, 1))                        # NCHW -> NHWC
    cols, (B, Ho, Wo) = _im2col(x, meta["KH"], meta["KW"], stride, padding,
                                meta["Kp"])
    out = matmul_bias_relu(cols, wm, bp)                           # (M, Np) f32
    out = out[:, :meta["Cout"]].reshape(B, Ho, Wo, meta["Cout"])
    return jnp.transpose(out, (0, 3, 1, 2))                        # NHWC -> NCHW


# ----------------------------------------------------------------------------
# Deterministic parameter construction (PyTorch nn.Conv2d default init)
# ----------------------------------------------------------------------------
def init_conv2d_params(key, in_c, out_c, k):
    fan_in = in_c * k * k
    bound = 1.0 / math.sqrt(fan_in)
    kw_, kb_ = jax.random.split(key)
    w = jax.random.uniform(kw_, (out_c, in_c, k, k), jnp.float32, -bound, bound)
    b = jax.random.uniform(kb_, (out_c,), jnp.float32, -bound, bound)
    return w, b


# ----------------------------------------------------------------------------
if __name__ == "__main__":
    batch, in_channels, spatial = 2, 4, 16
    out_channels, kernel_size, stride, padding = 16, 3, 1, 1

    root = jax.random.PRNGKey(0)
    k_w, k_x = jax.random.split(root)
    w, b = init_conv2d_params(k_w, in_channels, out_channels, kernel_size)
    x = jax.random.normal(k_x, (batch, in_channels, spatial, spatial), jnp.float32)

    # Hoisted, one-time weight packing into lane-dense matmul layout.
    wm, bp, meta = pack_conv2d_params(w, b)

    fwd = jax.jit(functools.partial(conv2d_relu_forward,
                                    meta=meta, stride=stride, padding=padding))
    out = fwd(x, wm, bp)
    jax.block_until_ready(out)

    Ho = (spatial + 2 * padding - kernel_size) // stride + 1
    assert out.shape == (batch, out_channels, Ho, Ho)
    assert bool(jnp.all(jnp.isfinite(out)))
    assert bool(jnp.all(out >= 0.0))                      # ReLU range

    # Reference check (f32 XLA conv); bf16 MXU operands -> loose tolerance.
    ref = jax.lax.conv_general_dilated(
        x, w, window_strides=(stride, stride),
        padding=((padding, padding), (padding, padding)),
        dimension_numbers=("NCHW", "OIHW", "NCHW"))
    ref = jnp.maximum(ref + b.reshape(1, -1, 1, 1), 0.0)
    assert bool(jnp.allclose(out, ref, atol=2e-2, rtol=2e-2))

    print("KERNEL_OK")
</pallas_src>

<mosaic_0001>
module attributes {stable_mosaic.version = 11 : i64} {
  func.func @_mm_bias_relu_kernel(%arg0: i32, %arg1: i32, %arg2: i32, %arg3: memref<256x128xbf16, #tpu.memory_space<vmem>>, %arg4: memref<128x128xbf16, #tpu.memory_space<vmem>>, %arg5: memref<1x128xf32, #tpu.memory_space<vmem>>, %arg6: memref<256x128xf32, #tpu.memory_space<vmem>>, %arg7: memref<256x128xf32, #tpu.memory_space<vmem>>) attributes {dimension_semantics = [#tpu.dimension_semantics<parallel>, #tpu.dimension_semantics<parallel>, #tpu.dimension_semantics<arbitrary>], iteration_bounds = array<i64: 2, 1, 1>, scalar_prefetch = 0 : i64, scratch_operands = 1 : i64, tpu.core_type = #tpu.core_type<tc>, window_params = [{transform_indices = @transform_0, window_bounds = array<i64: 256, 128>}, {transform_indices = @transform_1, window_bounds = array<i64: 128, 128>}, {transform_indices = @transform_2, window_bounds = array<i64: 1, 128>}, {transform_indices = @transform_3, window_bounds = array<i64: 256, 128>}]} {
    %c0_i32 = arith.constant 0 : i32
    %0 = arith.cmpi eq, %arg2, %c0_i32 : i32
    %1 = arith.extui %0 : i1 to i32
    %c0_i32_0 = arith.constant 0 : i32
    %2 = arith.cmpi ne, %1, %c0_i32_0 : i32
    scf.if %2 {
      %cst_10 = arith.constant 0.000000e+00 : f32
      %12 = vector.broadcast %cst_10 : f32 to vector<256x128xf32>
      %c0_11 = arith.constant 0 : index
      %c0_12 = arith.constant 0 : index
      %13 = vector.load %arg7[%c0_11, %c0_12] : memref<256x128xf32, #tpu.memory_space<vmem>>, vector<256x128xf32>
      tpu.vector_store %arg7[%c0_11, %c0_12], %12 {strides = array<i32>} : memref<256x128xf32, #tpu.memory_space<vmem>>, vector<256x128xf32>,
    } else {
    }
    %c0 = arith.constant 0 : index
    %c0_1 = arith.constant 0 : index
    %3 = vector.load %arg7[%c0, %c0_1] : memref<256x128xf32, #tpu.memory_space<vmem>>, vector<256x128xf32>
    %c0_2 = arith.constant 0 : index
    %c0_3 = arith.constant 0 : index
    %4 = vector.load %arg3[%c0_2, %c0_3] : memref<256x128xbf16, #tpu.memory_space<vmem>>, vector<256x128xbf16>
    %c0_4 = arith.constant 0 : index
    %c0_5 = arith.constant 0 : index
    %5 = vector.load %arg4[%c0_4, %c0_5] : memref<128x128xbf16, #tpu.memory_space<vmem>>, vector<128x128xbf16>
    %cst = arith.constant dense<0.000000e+00> : vector<256x128xf32>
    %6 = tpu.matmul %4, %5, %cst {dimension_numbers = #tpu.dot_dimension_numbers<[1], [0], [0], [1], [0, 0, 1, 1], [], []>} : vector<256x128xbf16>, vector<128x128xbf16>, vector<256x128xf32> -> vector<256x128xf32>
    %7 = arith.addf %3, %6 : vector<256x128xf32>
    %c0_6 = arith.constant 0 : index
    %c0_7 = arith.constant 0 : index
    %8 = vector.load %arg7[%c0_6, %c0_7] : memref<256x128xf32, #tpu.memory_space<vmem>>, vector<256x128xf32>
    tpu.vector_store %arg7[%c0_6, %c0_7], %7 {strides = array<i32>} : memref<256x128xf32, #tpu.memory_space<vmem>>, vector<256x128xf32>,
    %c0_i32_8 = arith.constant 0 : i32
    %9 = arith.cmpi eq, %arg2, %c0_i32_8 : i32
    %10 = arith.extui %9 : i1 to i32
    %c0_i32_9 = arith.constant 0 : i32
    %11 = arith.cmpi ne, %10, %c0_i32_9 : i32
    scf.if %11 {
      %c0_10 = arith.constant 0 : index
      %c0_11 = arith.constant 0 : index
      %12 = vector.load %arg7[%c0_10, %c0_11] : memref<256x128xf32, #tpu.memory_space<vmem>>, vector<256x128xf32>
      %c0_12 = arith.constant 0 : index
      %c0_13 = arith.constant 0 : index
      %13 = vector.load %arg5[%c0_12, %c0_13] : memref<1x128xf32, #tpu.memory_space<vmem>>, vector<1x128xf32>
      %14 = vector.broadcast %13 : vector<1x128xf32> to vector<256x128xf32>
      %15 = arith.addf %12, %14 : vector<256x128xf32>
      %cst_14 = arith.constant 0.000000e+00 : f32
      %16 = vector.broadcast %cst_14 : f32 to vector<256x128xf32>
      %17 = arith.maximumf %15, %16 : vector<256x128xf32>
      %c0_15 = arith.constant 0 : index
      %c0_16 = arith.constant 0 : index
      %18 = vector.load %arg6[%c0_15, %c0_16] : memref<256x128xf32, #tpu.memory_space<vmem>>, vector<256x128xf32>
      tpu.vector_store %arg6[%c0_15, %c0_16], %17 {strides = array<i32>} : memref<256x128xf32, #tpu.memory_space<vmem>>, vector<256x128xf32>,
    } else {
    }
    return
  }
  func.func @transform_0(%arg0: i32, %arg1: i32, %arg2: i32) -> (i32, i32) {
    %c0_i32 = arith.constant 0 : i32
    return %arg0, %arg2 : i32, i32
  }
  func.func @transform_1(%arg0: i32, %arg1: i32, %arg2: i32) -> (i32, i32) {
    %c0_i32 = arith.constant 0 : i32
    return %arg2, %arg1 : i32, i32
  }
  func.func @transform_2(%arg0: i32, %arg1: i32, %arg2: i32) -> (i32, i32) {
    %c0_i32 = arith.constant 0 : i32
    %c0_i32_0 = arith.constant 0 : i32
    return %c0_i32, %arg1 : i32, i32
  }
  func.func @transform_3(%arg0: i32, %arg1: i32, %arg2: i32) -> (i32, i32) {
    %c0_i32 = arith.constant 0 : i32
    return %arg0, %arg1 : i32, i32
  }
}

</mosaic_0001>

<bundles_post_ra>
// kernel: conv2d_relu_forward.1
= control target key start
LH: loop header
LB: loop body
LE: loop exit
PB: predicated region body
PF: predicated region fallthrough
CT: control target
= control target key end

     0   :  { %s1212_s12 = smov 0   ;;  %s1214_s13 = smov 0   ;;  %s1362_s0 = inlined_call_operand.vmem [shape: bf16[512,128], index: 0, kind: input, shape index: {}]   ;;  %s1363_s1 = inlined_call_operand.vmem [shape: bf16[128,128], index: 1, kind: input, shape index: {}]   ;;  %s1364_s2 = inlined_call_operand.vmem [shape: f32[1,128], index: 2, kind: input, shape index: {}]   ;;  %s1365_s3 = inlined_call_operand.vmem [shape: f32[512,128], index: 3, kind: output, shape index: {}]  }
   0x1   :  { %s1216_s14 = smov 0  }
   0x2 LB: > { %s32_s15 = sadd.s32 1, %s1186_s13  ;;  %p1000_p0 = scmp.ge.s32.totalorder %s1190_s14, 1  ;;  %s1190_s14 = sphi %s1216_s14, %s13_s14   ;;  %s1186_s13 = sphi %s1214_s13, %s1367_s13   ;;  %s1182_s12 = sphi %s1212_s12, %s1366_s12  }
   0x3   : > { %p34_p1 = scmp.ge.s32.totalorder %s32_s15, 2  ;;  %p188_p2 = scmp.lt.s32.totalorder %s1190_s14, 3 }
   0x5   : > { %s1369_s15 = smov (%p34_p1, %s32_s15), 0  ;;  %p189_p3 = pnand %p1000_p0, %p188_p2 }
   0x6   : > { %s1001_s18 = sshll.u32 (!%p189_p3), %s1182_s12, 5 }
   0x7   : > { %192 = sbr.rel (%p189_p3) target bundleno = 273 (0x111), region = 32  ;;  %p230_p4 = scmp.lt.s32.totalorder (!%p189_p3), %s1001_s18, 63 }
   0xc   : > { %v1144_v0 = vld [vmem:[%s1363_s1 + $0x38] sm:$0xff]   ;;  %v1145_v1 = vld [vmem:[%s1363_s1 + $0x30] sm:$0xff]   ;;  %s1371_s18 = smov (!%p230_p4, %s1001_s18), 63  ;;  %v1146_v2 = vld [vmem:[%s1363_s1 + $0x28] sm:$0xff]  }
   0xd   : > { %1056 = vmatprep.subr.bf16.mxu0 %v1144_v0  ;;  %1104 = vmatprep.subr.bf16.mxu1 %v1144_v0  ;;  %s1002_s23 = sshll.u32 %s1371_s18, 2  ;;  %v1147_v3 = vld [vmem:[%s1363_s1 + $0x20] sm:$0xff]   ;;  %v1148_v6 = vld [vmem:[%s1363_s1 + $0x18] sm:$0xff]   ;;  %v1149_v7 = vld [vmem:[%s1363_s1 + $0x10] sm:$0xff]   ;;  %s1004_s12 = sshll.u32 %s1371_s18, 3 }
   0xe   : > { %1057 = vmatpush3.bf16.msra.mxu0 %v1144_v0  ;;  %1112 = vmatpush3.bf16.msra.mxu1 %v1144_v0  ;;  %s1245_s26 = scalar_lea.vmem %s1362_s0, %s1002_s23  ;;  %v1150_v8 = vld [vmem:[%s1363_s1 + $0x8] sm:$0xff]   ;;  %v1151_v9 = vld [vmem:[%s1363_s1] sm:$0xff]   ;;  %s1289_s19 = scalar_lea.vmem %s1365_s3, %s1004_s12 }
   0xf   : > { %1058 = vmatprep.subr.bf16.mxu0 %v1145_v1  ;;  %1105 = vmatprep.subr.bf16.mxu1 %v1145_v1  ;;  %v1152_v4 = vld [vmem:[%s1245_s26] sm:$0xff]   ;;  %v1154_v10 = vld [vmem:[%s1245_s26 + $0x8] sm:$0xff]   ;;  %v1156_v12 = vld [vmem:[%s1245_s26 + $0x10] sm:$0xff]  }
  0x10   : > { %v1153_v5 = vld [vmem:[%s1245_s26 + $0x40] sm:$0xff]   ;;  %1072 = vmatprep.mubr.bf16.mxu0 %v1152_v4  ;;  %v1155_v11 = vld [vmem:[%s1245_s26 + $0x48] sm:$0xff]   ;;  %v1157_v13 = vld [vmem:[%s1245_s26 + $0x50] sm:$0xff]  }
  0x11   : > { %1088 = vmatprep.mubr.bf16.mxu1 %v1153_v5  ;;  %v1158_v14 = vld [vmem:[%s1245_s26 + $0x18] sm:$0xff]   ;;  %v1160_v16 = vld [vmem:[%s1245_s26 + $0x20] sm:$0xff]   ;;  %v1162_v18 = vld [vmem:[%s1245_s26 + $0x28] sm:$0xff]  }
  0x12   : > { %1059 = vmatpush3.bf16.msra.mxu0 %v1145_v1  ;;  %1113 = vmatpush3.bf16.msra.mxu1 %v1145_v1  ;;  %v1159_v15 = vld [vmem:[%s1245_s26 + $0x58] sm:$0xff]   ;;  %v1161_v17 = vld [vmem:[%s1245_s26 + $0x60] sm:$0xff]   ;;  %v1163_v19 = vld [vmem:[%s1245_s26 + $0x68] sm:$0xff]  }
  0x13   : > { %1060 = vmatprep.subr.bf16.mxu0 %v1146_v2  ;;  %1106 = vmatprep.subr.bf16.mxu1 %v1146_v2  ;;  %v1164_v20 = vld [vmem:[%s1245_s26 + $0x30] sm:$0xff]   ;;  %v1166_v22 = vld [vmem:[%s1245_s26 + $0x38] sm:$0xff]   ;;  %v1281_v24 = vld [vmem:[%s1364_s2] ss:$0 sm:$0xff] }
  0x14   : > { %v1165_v21 = vld [vmem:[%s1245_s26 + $0x70] sm:$0xff]   ;;  %v1167_v23 = vld [vmem:[%s1245_s26 + $0x78] sm:$0xff]  }
  0x16   : > { %1061 = vmatpush3.bf16.msra.mxu0 %v1146_v2  ;;  %1114 = vmatpush3.bf16.msra.mxu1 %v1146_v2 }
  0x17   : > { %1062 = vmatprep.subr.bf16.mxu0 %v1147_v3  ;;  %1107 = vmatprep.subr.bf16.mxu1 %v1147_v3 }
  0x1a   : > { %1063 = vmatpush3.bf16.msra.mxu0 %v1147_v3  ;;  %1115 = vmatpush3.bf16.msra.mxu1 %v1147_v3 }
  0x1b   : > { %1064 = vmatprep.subr.bf16.mxu0 %v1148_v6  ;;  %1108 = vmatprep.subr.bf16.mxu1 %v1148_v6 }
  0x1e   : > { %1065 = vmatpush3.bf16.msra.mxu0 %v1148_v6  ;;  %1116 = vmatpush3.bf16.msra.mxu1 %v1148_v6 }
  0x1f   : > { %1066 = vmatprep.subr.bf16.mxu0 %v1149_v7  ;;  %1109 = vmatprep.subr.bf16.mxu1 %v1149_v7 }
  0x22   : > { %1067 = vmatpush3.bf16.msra.mxu0 %v1149_v7  ;;  %1117 = vmatpush3.bf16.msra.mxu1 %v1149_v7 }
  0x23   : > { %1068 = vmatprep.subr.bf16.mxu0 %v1150_v8  ;;  %1110 = vmatprep.subr.bf16.mxu1 %v1150_v8 }
  0x26   : > { %1069 = vmatpush3.bf16.msra.mxu0 %v1150_v8  ;;  %1118 = vmatpush3.bf16.msra.mxu1 %v1150_v8 }
  0x27   : > { %1070 = vmatprep.subr.bf16.mxu0 %v1151_v9  ;;  %1111 = vmatprep.subr.bf16.mxu1 %v1151_v9 }
  0x2a   : > { %1071 = vmatpush3.bf16.msra.mxu0 %v1151_v9  ;;  %1119 = vmatpush3.bf16.msra.mxu1 %v1151_v9 }
  0x2d   : > { %1073 = vmatmul.mubr.bf16.vlgmr.msra.gmra.mxu0 %v1154_v10  ;;  %1089 = vmatmul.mubr.bf16.vlgmr.msra.gmra.mxu1 %v1155_v11 }
  0x2e   : > { %1076 = vmatprep.mubr.bf16.mxu0 %v1156_v12  ;;  %1092 = vmatprep.mubr.bf16.mxu1 %v1157_v13 }
  0x35   : > { %1077 = vmatmul.mubr.bf16.gmra.mxu0 %v1158_v14  ;;  %1093 = vmatmul.mubr.bf16.gmra.mxu1 %v1159_v15 }
  0x36   : > { %1080 = vmatprep.mubr.bf16.mxu0 %v1160_v16  ;;  %1096 = vmatprep.mubr.bf16.mxu1 %v1161_v17 }
  0x3d   : > { %1081 = vmatmul.mubr.bf16.gmra.mxu0 %v1162_v18  ;;  %1097 = vmatmul.mubr.bf16.gmra.mxu1 %v1163_v19 }
  0x3e   : > { %1084 = vmatprep.mubr.bf16.mxu0 %v1164_v20  ;;  %1100 = vmatprep.mubr.bf16.mxu1 %v1165_v21 }
  0x45   : > { %1085 = vmatmul.mubr.bf16.gmra.mxu0 %v1166_v22  ;;  %1101 = vmatmul.mubr.bf16.gmra.mxu1 %v1167_v23 }
  0xed   : > { %v1074_v25 = vpop.f32.mrf.mxu0  ;;  %v1090_v26 = vpop.f32.mrf.mxu1 }
  0xee   : > { %v789_v27 = vadd.f32 %v1074_v25, %v1281_v24  ;;  %v805_v28 = vadd.f32 %v1090_v26, %v1281_v24 }
  0xef   : > { %v554_v29 = vpop.f32.mrf.mxu0  ;;  %v618_v30 = vpop.f32.mrf.mxu1 }
  0xf0   : > { %v821_v31 = vmax.f32 %v789_v27, 0.0  ;;  %v837_v32 = vmax.f32 %v805_v28, 0.0  ;;  %v787_v33 = vadd.f32 %v1281_v24, %v554_v29  ;;  %v803_v34 = vadd.f32 %v1281_v24, %v618_v30 }
  0xf1   : > { %v1075_v35 = vpop.f32.mrf.mxu0  ;;  %v1091_v36 = vpop.f32.mrf.mxu1 }
  0xf2   : > { %853 = vst [vmem:[%s1289_s19 + $0x10] sm:$0xff] %v821_v31  ;;  %869 = vst [vmem:[%s1289_s19 + $0x90] sm:$0xff] %v837_v32  ;;  %v819_v37 = vmax.f32 %v787_v33, 0.0  ;;  %v835_v38 = vmax.f32 %v803_v34, 0.0  ;;  %v790_v39 = vadd.f32 %v1075_v35, %v1281_v24  ;;  %v806_v40 = vadd.f32 %v1091_v36, %v1281_v24 }
  0xf3   : > { %v557_v41 = vpop.f32.mrf.mxu0  ;;  %v621_v42 = vpop.f32.mrf.mxu1 }
  0xf4   : > { %851 = vst [vmem:[%s1289_s19] sm:$0xff] %v819_v37  ;;  %867 = vst [vmem:[%s1289_s19 + $0x80] sm:$0xff] %v835_v38  ;;  %v822_v43 = vmax.f32 %v790_v39, 0.0  ;;  %v838_v44 = vmax.f32 %v806_v40, 0.0  ;;  %v788_v45 = vadd.f32 %v1281_v24, %v557_v41  ;;  %v804_v46 = vadd.f32 %v1281_v24, %v621_v42 }
  0xf5   : > { %v1078_v47 = vpop.f32.mrf.mxu0  ;;  %v1094_v48 = vpop.f32.mrf.mxu1 }
  0xf6   : > { %854 = vst [vmem:[%s1289_s19 + $0x18] sm:$0xff] %v822_v43  ;;  %870 = vst [vmem:[%s1289_s19 + $0x98] sm:$0xff] %v838_v44  ;;  %v820_v49 = vmax.f32 %v788_v45, 0.0  ;;  %v836_v50 = vmax.f32 %v804_v46, 0.0  ;;  %v793_v51 = vadd.f32 %v1078_v47, %v1281_v24  ;;  %v809_v52 = vadd.f32 %v1094_v48, %v1281_v24 }
  0xf7   : > { %v570_v53 = vpop.f32.mrf.mxu0  ;;  %v634_v54 = vpop.f32.mrf.mxu1 }
  0xf8   : > { %852 = vst [vmem:[%s1289_s19 + $0x8] sm:$0xff] %v820_v49  ;;  %868 = vst [vmem:[%s1289_s19 + $0x88] sm:$0xff] %v836_v50  ;;  %v825_v55 = vmax.f32 %v793_v51, 0.0  ;;  %v841_v56 = vmax.f32 %v809_v52, 0.0  ;;  %v791_v57 = vadd.f32 %v1281_v24, %v570_v53  ;;  %v807_v58 = vadd.f32 %v1281_v24, %v634_v54 }
  0xf9   : > { %v1079_v59 = vpop.f32.mrf.mxu0  ;;  %v1095_v60 = vpop.f32.mrf.mxu1 }
  0xfa   : > { %857 = vst [vmem:[%s1289_s19 + $0x30] sm:$0xff] %v825_v55  ;;  %873 = vst [vmem:[%s1289_s19 + $0xb0] sm:$0xff] %v841_v56  ;;  %v823_v61 = vmax.f32 %v791_v57, 0.0  ;;  %v839_v62 = vmax.f32 %v807_v58, 0.0  ;;  %v794_v63 = vadd.f32 %v1079_v59, %v1281_v24  ;;  %v810_v0 = vadd.f32 %v1095_v60, %v1281_v24 }
  0xfb   : > { %v573_v1 = vpop.f32.mrf.mxu0  ;;  %v637_v2 = vpop.f32.mrf.mxu1 }
  0xfc   : > { %855 = vst [vmem:[%s1289_s19 + $0x20] sm:$0xff] %v823_v61  ;;  %871 = vst [vmem:[%s1289_s19 + $0xa0] sm:$0xff] %v839_v62  ;;  %v826_v3 = vmax.f32 %v794_v63, 0.0  ;;  %v842_v4 = vmax.f32 %v810_v0, 0.0  ;;  %v792_v5 = vadd.f32 %v1281_v24, %v573_v1  ;;  %v808_v6 = vadd.f32 %v1281_v24, %v637_v2 }
  0xfd   : > { %v1082_v7 = vpop.f32.mrf.mxu0  ;;  %v1098_v8 = vpop.f32.mrf.mxu1 }
  0xfe   : > { %858 = vst [vmem:[%s1289_s19 + $0x38] sm:$0xff] %v826_v3  ;;  %874 = vst [vmem:[%s1289_s19 + $0xb8] sm:$0xff] %v842_v4  ;;  %v824_v9 = vmax.f32 %v792_v5, 0.0  ;;  %v840_v10 = vmax.f32 %v808_v6, 0.0  ;;  %v797_v11 = vadd.f32 %v1082_v7, %v1281_v24  ;;  %v813_v12 = vadd.f32 %v1098_v8, %v1281_v24 }
  0xff   : > { %v586_v13 = vpop.f32.mrf.mxu0  ;;  %v650_v14 = vpop.f32.mrf.mxu1 }
 0x100   : > { %856 = vst [vmem:[%s1289_s19 + $0x28] sm:$0xff] %v824_v9  ;;  %872 = vst [vmem:[%s1289_s19 + $0xa8] sm:$0xff] %v840_v10  ;;  %v829_v15 = vmax.f32 %v797_v11, 0.0  ;;  %v845_v16 = vmax.f32 %v813_v12, 0.0  ;;  %v795_v17 = vadd.f32 %v1281_v24, %v586_v13  ;;  %v811_v18 = vadd.f32 %v1281_v24, %v650_v14 }
 0x101   : > { %v1083_v19 = vpop.f32.mrf.mxu0  ;;  %v1099_v20 = vpop.f32.mrf.mxu1 }
 0x102   : > { %861 = vst [vmem:[%s1289_s19 + $0x50] sm:$0xff] %v829_v15  ;;  %877 = vst [vmem:[%s1289_s19 + $0xd0] sm:$0xff] %v845_v16  ;;  %v827_v21 = vmax.f32 %v795_v17, 0.0  ;;  %v843_v22 = vmax.f32 %v811_v18, 0.0  ;;  %v798_v23 = vadd.f32 %v1083_v19, %v1281_v24  ;;  %v814_v25 = vadd.f32 %v1099_v20, %v1281_v24 }
 0x103   : > { %v589_v26 = vpop.f32.mrf.mxu0  ;;  %v653_v27 = vpop.f32.mrf.mxu1 }
 0x104   : > { %859 = vst [vmem:[%s1289_s19 + $0x40] sm:$0xff] %v827_v21  ;;  %875 = vst [vmem:[%s1289_s19 + $0xc0] sm:$0xff] %v843_v22  ;;  %v830_v28 = vmax.f32 %v798_v23, 0.0  ;;  %v846_v29 = vmax.f32 %v814_v25, 0.0  ;;  %v796_v30 = vadd.f32 %v1281_v24, %v589_v26  ;;  %v812_v31 = vadd.f32 %v1281_v24, %v653_v27 }
 0x105   : > { %v1086_v32 = vpop.f32.mrf.mxu0  ;;  %v1102_v33 = vpop.f32.mrf.mxu1 }
 0x106   : > { %862 = vst [vmem:[%s1289_s19 + $0x58] sm:$0xff] %v830_v28  ;;  %878 = vst [vmem:[%s1289_s19 + $0xd8] sm:$0xff] %v846_v29  ;;  %v828_v34 = vmax.f32 %v796_v30, 0.0  ;;  %v844_v35 = vmax.f32 %v812_v31, 0.0  ;;  %v801_v36 = vadd.f32 %v1086_v32, %v1281_v24  ;;  %v817_v37 = vadd.f32 %v1102_v33, %v1281_v24 }
 0x107   : > { %v602_v38 = vpop.f32.mrf.mxu0  ;;  %v666_v39 = vpop.f32.mrf.mxu1 }
 0x108   : > { %860 = vst [vmem:[%s1289_s19 + $0x48] sm:$0xff] %v828_v34  ;;  %876 = vst [vmem:[%s1289_s19 + $0xc8] sm:$0xff] %v844_v35  ;;  %v833_v40 = vmax.f32 %v801_v36, 0.0  ;;  %v849_v41 = vmax.f32 %v817_v37, 0.0  ;;  %v799_v42 = vadd.f32 %v1281_v24, %v602_v38  ;;  %v815_v43 = vadd.f32 %v1281_v24, %v666_v39 }
 0x109   : > { %v1087_v44 = vpop.f32.mrf.mxu0  ;;  %v1103_v45 = vpop.f32.mrf.mxu1 }
 0x10a   : > { %865 = vst [vmem:[%s1289_s19 + $0x70] sm:$0xff] %v833_v40  ;;  %881 = vst [vmem:[%s1289_s19 + $0xf0] sm:$0xff] %v849_v41  ;;  %v831_v46 = vmax.f32 %v799_v42, 0.0  ;;  %v847_v47 = vmax.f32 %v815_v43, 0.0  ;;  %v802_v48 = vadd.f32 %v1087_v44, %v1281_v24  ;;  %v818_v49 = vadd.f32 %v1103_v45, %v1281_v24 }
 0x10b   : > { %v605_v50 = vpop.f32.mrf.mxu0  ;;  %v669_v51 = vpop.f32.mrf.mxu1 }
 0x10c   : > { %863 = vst [vmem:[%s1289_s19 + $0x60] sm:$0xff] %v831_v46  ;;  %879 = vst [vmem:[%s1289_s19 + $0xe0] sm:$0xff] %v847_v47  ;;  %v834_v52 = vmax.f32 %v802_v48, 0.0  ;;  %v850_v53 = vmax.f32 %v818_v49, 0.0  ;;  %v800_v54 = vadd.f32 %v1281_v24, %v605_v50  ;;  %v816_v55 = vadd.f32 %v1281_v24, %v669_v51 }
 0x10e   : > { %866 = vst [vmem:[%s1289_s19 + $0x78] sm:$0xff] %v834_v52  ;;  %882 = vst [vmem:[%s1289_s19 + $0xf8] sm:$0xff] %v850_v53  ;;  %v832_v56 = vmax.f32 %v800_v54, 0.0  ;;  %v848_v57 = vmax.f32 %v816_v55, 0.0 }
 0x110   : > { %864 = vst [vmem:[%s1289_s19 + $0x68] sm:$0xff] %v832_v56  ;;  %880 = vst [vmem:[%s1289_s19 + $0xe8] sm:$0xff] %v848_v57 }
 0x111 PF: > { %s13_s14 = sadd.s32 1, %s1190_s14   ;;  %s1366_s12 = smov %s1186_s13 }
 0x112   : > { %p10_p5 = scmp.ge.s32.totalorder %s13_s14, 4   ;;  %s1367_s13 = smov %s1369_s15 }
 0x114   :  { %12 = sbr.rel (!%p10_p5) target bundleno = 2 (0x2), region = 76 }

</bundles_post_ra>
